<compile_context>
chip_gen: v5e
topology: v5e:2x2
jax: 0.10.0
libtpu: 0.0.40
codegen_flags: <defaults>
</compile_context>

<pallas_src>
import functools
import math

import jax
import jax.numpy as jnp
from jax.experimental import pallas as pl
from jax.experimental.pallas import tpu as pltpu


def attn_decoder_kernel(gates_ref, enc_attn_ref, attn_b_enc_ref, enc_wc_ref,
                        whc_wh_ref, whc_b_ref, ws_w_ref, ws_b_ref,
                        out_ref, attn_wts_ref, *, hidden, enc_len):
    f32 = jnp.float32
    bf16 = jnp.bfloat16
    H = hidden

    # ---- LSTM layer-0 forward step from zero state --------------------------------
    # gates_ref already holds (embed[tok] @ W_ih^T + b_ih + b_hh): embedding gather,
    # input projection and bias are folded into one row gather in the wrapper, so the
    # kernel carries no vocab-sized weight. h0 == c0 == 0 -> no W_hh term, no f*c0.
    gates = gates_ref[...]                                        # (TM, 4H) i,f,g,o

    # Gate nonlinearities as one full-vreg blend (4H == 128 == one vreg row).
    glane = jax.lax.broadcasted_iota(jnp.int32, gates.shape, 1)
    is_g = (glane >= 2 * H) & (glane < 3 * H)
    act = jnp.where(is_g, jnp.tanh(gates), jax.nn.sigmoid(gates))
    i_g = act[:, 0:H]
    g_g = act[:, 2 * H:3 * H]
    o_g = act[:, 3 * H:4 * H]
    c = i_g * g_g                                                 # c0 == 0 -> f*c0 dead
    h = o_g * jnp.tanh(c)                                         # (TM, H) == h[0] rows
    h_bf = h.astype(bf16)                                         # MXU operand dtype

    # ---- attention: score path re-associated into the encoder precompute ----------
    # (h @ attn_W^T + attn_b) @ enc^T == h @ enc_attn + attn_b_enc  (one MXU pass).
    scores = (jnp.dot(h_bf, enc_attn_ref[...], preferred_element_type=f32)
              + attn_b_enc_ref[...])                              # (TM, L_PAD)
    llane = jax.lax.broadcasted_iota(jnp.int32, scores.shape, 1)
    scores = jnp.where(llane < enc_len, scores, -1e30)            # mask padded lanes
    m = jnp.max(scores, axis=1, keepdims=True)
    e = jnp.exp(scores - m)                                       # padded lanes -> 0
    inv = pl.reciprocal(jnp.sum(e, axis=1, keepdims=True), approx=True)   # EUP slot
    aw = e * inv                                                  # softmax over dim=1
    attn_wts_ref[...] = aw                                        # lane-dense store

    # ---- Whc on cat([h, ctx]) + tanh, ctx path re-associated -----------------------
    # Whc([h; ctx]) = h @ Wh + ctx @ Wc = h @ Wh + aw @ (enc @ Wc); enc @ Wc is a
    # per-encoder precompute, so no lane concat and one fewer MXU pass.
    aux = (jnp.dot(h_bf, whc_wh_ref[...], preferred_element_type=f32)
           + jnp.dot(aw.astype(bf16), enc_wc_ref[...], preferred_element_type=f32)
           + whc_b_ref[...])                                      # (TM, H)
    out_hc = jnp.tanh(aux)

    # ---- output projection + log_softmax -------------------------------------------
    logits = (jnp.dot(out_hc.astype(bf16), ws_w_ref[...], preferred_element_type=f32)
              + ws_b_ref[...])                                    # (TM, V)
    mx = jnp.max(logits, axis=1, keepdims=True)
    lse = jnp.log(jnp.sum(jnp.exp(logits - mx), axis=1, keepdims=True)) + mx
    out_ref[...] = logits - lse


def precompute_encoder(params, enc):
    """Token-independent per-encoder precompute. Run ONCE per source sentence and
    reused for every decode step, so these matmuls amortize to ~zero."""
    L, two_h = enc.shape
    H = two_h // 2
    L_PAD = pl.cdiv(L, 128) * 128                  # lane-dense score / attn-weight width
    enc_pad = jnp.zeros((L_PAD, 2 * H), jnp.float32).at[:L].set(enc.astype(jnp.float32))
    # score path:  (h @ attn_W^T + attn_b) @ enc^T == h @ enc_attn + attn_b_enc
    enc_attn = (params["attn_w_t"] @ enc_pad.T).astype(jnp.bfloat16)       # (H, L_PAD)
    attn_b_enc = params["attn_b"] @ enc_pad.T                              # (1, L_PAD)
    # ctx path:    ctx @ Wc == attn_weights @ (enc @ Wc)
    enc_wc = (enc_pad @ params["whc_wc_t"]).astype(jnp.bfloat16)           # (L_PAD, H)
    return dict(enc_attn=enc_attn, attn_b_enc=attn_b_enc, enc_wc=enc_wc, enc_len=L)


def attn_decoder_forward(params, tokens, enc_pre, *, tile_m=None):
    """Batched decoder step: each row of `tokens` is an independent forward() call
    (zero initial LSTM state) against one shared, precomputed encoder output."""
    tokens = jnp.asarray(tokens, jnp.int32).reshape(-1)
    M = tokens.shape[0]
    H = params["whc_wh_t"].shape[0]
    V = params["ws_b"].shape[1]
    L = enc_pre["enc_len"]
    L_PAD = enc_pre["enc_attn"].shape[1]

    # Grid collapse / MXU fill: one grid step at demo sizes (tile_m == M). At
    # production keep tile_m >= 128 (v5e) / 256 (v6e, v7x); on v7x prefer
    # tile_m = M // 2 so the "parallel" axis feeds both TensorCores.
    if tile_m is None:
        tile_m = min(M, 256)
    assert M % tile_m == 0 and tile_m % 8 == 0, "tile_m must divide M and be 8-aligned"

    # Embedding lookup + LSTM input projection + bias fused into ONE XLA row gather
    # on the precomputed (V, 4H) table: no vocab-sized weight in VMEM, no one-hot
    # matmul, no token block inside the kernel.
    gates_in = params["wtok_b"][tokens]                            # (M, 4H) f32

    args = (gates_in,
            enc_pre["enc_attn"], enc_pre["attn_b_enc"], enc_pre["enc_wc"],
            params["whc_wh_bf"], params["whc_b"],
            params["ws_w_bf"], params["ws_b"])

    def row_block(a):                      # blocked over the batch rows
        tail = tuple(a.shape[1:])
        return pl.BlockSpec((tile_m,) + tail, lambda i: (i,) + (0,) * len(tail))

    def bcast_block(a):                    # whole array, same block every grid step
        zeros = (0,) * a.ndim
        return pl.BlockSpec(a.shape, lambda i: zeros)
        # TODO(synk): at production sizes on v7x (64 MiB VMEM) single-buffer these
        # invariant weights (pipeline_mode=pl.Buffered(1)) and block the vocab dim of
        # ws_w over a second grid axis instead of holding it whole.

    in_specs = [row_block(gates_in)] + [bcast_block(a) for a in args[1:]]
    out_specs = (pl.BlockSpec((tile_m, V), lambda i: (i, 0)),
                 pl.BlockSpec((tile_m, L_PAD), lambda i: (i, 0)))
    out_shape = (jax.ShapeDtypeStruct((M, V), jnp.float32),       # log_softmax output
                 jax.ShapeDtypeStruct((M, L_PAD), jnp.float32))   # padded attn weights

    flops = 2 * M * (H * L_PAD + H * H + L_PAD * H + H * V)
    transcendentals = M * (4 * H + H + L_PAD + H + V)
    bytes_accessed = (4 * M * 4 * H + 2 * H * L_PAD + 4 * L_PAD + 2 * L_PAD * H
                      + 2 * H * H + 4 * H + 2 * H * V + 4 * V
                      + 4 * M * V + 4 * M * L_PAD)

    kernel = functools.partial(attn_decoder_kernel, hidden=H, enc_len=L)
    out, aw_pad = pl.pallas_call(
        kernel,
        out_shape=out_shape,
        grid=(M // tile_m,),
        in_specs=in_specs,
        out_specs=out_specs,
        compiler_params=pltpu.CompilerParams(
            dimension_semantics=("parallel",),     # independent rows: shard over TCs
            vmem_limit_bytes=32 * 1024 * 1024),
        cost_estimate=pl.CostEstimate(flops=flops,
                                      transcendentals=transcendentals,
                                      bytes_accessed=bytes_accessed),
    )(*args)
    return out, aw_pad[:, :L]


def init_params(key, vocab, E, H):
    ks = jax.random.split(key, 11)
    u = lambda k, shape, s: jax.random.uniform(k, shape, jnp.float32, -s, s)
    s_h = 1.0 / math.sqrt(H)
    s_3h = 1.0 / math.sqrt(3 * H)

    embed = jax.random.normal(ks[0], (vocab, E), jnp.float32) * 0.1
    w_ih = u(ks[1], (4 * H, E), s_h)          # torch.nn.LSTM weight_ih_l0
    _w_hh = u(ks[2], (4 * H, H), s_h)         # unused: initial hidden state is zero
    b_ih = u(ks[3], (4 * H,), s_h)
    b_hh = u(ks[4], (4 * H,), s_h)
    attn_W = u(ks[5], (2 * H, H), s_h)        # Linear(H, 2H)
    attn_b = u(ks[6], (2 * H,), s_h)
    whc_W = u(ks[7], (H, 3 * H), s_3h)        # Linear(3H, H)
    whc_b = u(ks[8], (H,), s_3h)
    ws_W = u(ks[9], (vocab, H), s_h)          # Linear(H, vocab)
    ws_b = u(ks[10], (vocab,), s_h)

    wih_t = w_ih.T
    b = (b_ih + b_hh).reshape(1, 4 * H)
    whc_wh_t = whc_W[:, :H].T
    ws_w_t = ws_W.T
    return dict(
        # f32 reference copies
        embed=embed, wih_t=wih_t, b=b,
        attn_w_t=attn_W.T, attn_b=attn_b.reshape(1, 2 * H),
        whc_wh_t=whc_wh_t, whc_wc_t=whc_W[:, H:].T, whc_b=whc_b.reshape(1, H),
        ws_w_t=ws_w_t, ws_b=ws_b.reshape(1, vocab),
        # kernel-side precomputes (once per model): fused embed->gates table,
        # bf16 MXU operands
        wtok_b=embed @ wih_t + b,                                 # (V, 4H) f32
        whc_wh_bf=whc_wh_t.astype(jnp.bfloat16),
        ws_w_bf=ws_w_t.astype(jnp.bfloat16),
    )


def reference_forward(params, tokens, enc):
    """Pure-JAX f32 reference of the same math (batched, zero initial state)."""
    H = params["whc_wh_t"].shape[0]
    x = params["embed"][tokens]                              # embedding; dropout(p=0) = id
    gates = x @ params["wih_t"] + params["b"]                # h0 == 0 -> no W_hh term
    i = jax.nn.sigmoid(gates[:, :H])
    g = jnp.tanh(gates[:, 2 * H:3 * H])
    o = jax.nn.sigmoid(gates[:, 3 * H:])
    c = i * g                                                # c0 == 0 -> f*c0 == 0
    h = o * jnp.tanh(c)
    attn_h = h @ params["attn_w_t"] + params["attn_b"]
    scores = attn_h @ enc.T
    aw = jax.nn.softmax(scores, axis=1)
    ctx = aw @ enc
    aux = h @ params["whc_wh_t"] + ctx @ params["whc_wc_t"] + params["whc_b"]
    out_hc = jnp.tanh(aux)
    logits = out_hc @ params["ws_w_t"] + params["ws_b"]
    return jax.nn.log_softmax(logits, axis=1), aw


if __name__ == "__main__":
    vocab_t_size = 128
    embed_size = 32
    hidden_size = 32
    max_length = 16        # number of encoder timesteps L
    batch = 16             # independent decoder invocations batched on MXU rows
    # dropout = 0.0 -> identity; num_layers = 2 (only layer-0 fwd affects outputs)

    key = jax.random.PRNGKey(0)
    pkey, ekey, tkey = jax.random.split(key, 3)
    params = init_params(pkey, vocab_t_size, embed_size, hidden_size)
    encoder_outputs = jax.random.normal(
        ekey, (max_length, 2 * hidden_size), jnp.float32)
    tokens = jax.random.randint(tkey, (batch,), 0, vocab_t_size, dtype=jnp.int32)

    enc_pre = precompute_encoder(params, encoder_outputs)   # hoisted: once per source
    output, attn_weights = attn_decoder_forward(params, tokens, enc_pre)
    output = jax.block_until_ready(output)
    attn_weights = jax.block_until_ready(attn_weights)

    ref_out, ref_aw = reference_forward(params, tokens, encoder_outputs)
    assert output.shape == (batch, vocab_t_size)
    assert attn_weights.shape == (batch, max_length)
    # bf16 MXU operands + approx reciprocal -> looser tolerance than pure-f32.
    assert jnp.allclose(output, ref_out, atol=5e-2, rtol=5e-2)
    assert jnp.allclose(attn_weights, ref_aw, atol=2e-2, rtol=2e-2)

    print("KERNEL_OK")
</pallas_src>

<mosaic_0001>
module attributes {stable_mosaic.version = 11 : i64} {
  func.func @attn_decoder_kernel(%arg0: i32, %arg1: memref<16x128xf32, #tpu.memory_space<vmem>>, %arg2: memref<32x128xbf16, #tpu.memory_space<vmem>>, %arg3: memref<1x128xf32, #tpu.memory_space<vmem>>, %arg4: memref<128x32xbf16, #tpu.memory_space<vmem>>, %arg5: memref<32x32xbf16, #tpu.memory_space<vmem>>, %arg6: memref<1x32xf32, #tpu.memory_space<vmem>>, %arg7: memref<32x128xbf16, #tpu.memory_space<vmem>>, %arg8: memref<1x128xf32, #tpu.memory_space<vmem>>, %arg9: memref<16x128xf32, #tpu.memory_space<vmem>>, %arg10: memref<16x128xf32, #tpu.memory_space<vmem>>) attributes {dimension_semantics = [#tpu.dimension_semantics<parallel>], iteration_bounds = array<i64: 1>, scalar_prefetch = 0 : i64, scratch_operands = 0 : i64, tpu.core_type = #tpu.core_type<tc>, window_params = [{transform_indices = @transform_0, window_bounds = array<i64: 16, 128>}, {pipeline_mode = #tpu.pipeline_mode<synchronous>, transform_indices = @transform_1, window_bounds = array<i64: 32, 128>}, {pipeline_mode = #tpu.pipeline_mode<synchronous>, transform_indices = @transform_2, window_bounds = array<i64: 1, 128>}, {pipeline_mode = #tpu.pipeline_mode<synchronous>, transform_indices = @transform_3, window_bounds = array<i64: 128, 32>}, {pipeline_mode = #tpu.pipeline_mode<synchronous>, transform_indices = @transform_4, window_bounds = array<i64: 32, 32>}, {pipeline_mode = #tpu.pipeline_mode<synchronous>, transform_indices = @transform_5, window_bounds = array<i64: 1, 32>}, {pipeline_mode = #tpu.pipeline_mode<synchronous>, transform_indices = @transform_6, window_bounds = array<i64: 32, 128>}, {pipeline_mode = #tpu.pipeline_mode<synchronous>, transform_indices = @transform_7, window_bounds = array<i64: 1, 128>}, {transform_indices = @transform_8, window_bounds = array<i64: 16, 128>}, {transform_indices = @transform_9, window_bounds = array<i64: 16, 128>}]} {
    %c0 = arith.constant 0 : index
    %c0_0 = arith.constant 0 : index
    %0 = vector.load %arg1[%c0, %c0_0] : memref<16x128xf32, #tpu.memory_space<vmem>>, vector<16x128xf32>
    %1 = tpu.iota {dimensions = array<i32: 1>} : vector<16x128xi32>
    %c64_i32 = arith.constant 64 : i32
    %2 = vector.broadcast %c64_i32 : i32 to vector<16x128xi32>
    %3 = arith.cmpi sge, %1, %2 : vector<16x128xi32>
    %c96_i32 = arith.constant 96 : i32
    %4 = vector.broadcast %c96_i32 : i32 to vector<16x128xi32>
    %5 = arith.cmpi slt, %1, %4 : vector<16x128xi32>
    %6 = arith.andi %3, %5 : vector<16x128xi1>
    %7 = math.tanh %0 : vector<16x128xf32>
    %8 = arith.negf %0 : vector<16x128xf32>
    %9 = math.exp %8 : vector<16x128xf32>
    %cst = arith.constant 1.000000e+00 : f32
    %10 = vector.broadcast %cst : f32 to vector<16x128xf32>
    %11 = arith.addf %10, %9 : vector<16x128xf32>
    %12 = arith.divf %10, %11 : vector<16x128xf32>
    %13 = arith.select %6, %7, %12 : vector<16x128xi1>, vector<16x128xf32>
    %14 = vector.extract_strided_slice %13 {offsets = [0, 0], sizes = [16, 32], strides = [1, 1]} : vector<16x128xf32> to vector<16x32xf32>
    %15 = vector.extract_strided_slice %13 {offsets = [0, 64], sizes = [16, 32], strides = [1, 1]} : vector<16x128xf32> to vector<16x32xf32>
    %16 = vector.extract_strided_slice %13 {offsets = [0, 96], sizes = [16, 32], strides = [1, 1]} : vector<16x128xf32> to vector<16x32xf32>
    %17 = arith.mulf %14, %15 : vector<16x32xf32>
    %18 = math.tanh %17 : vector<16x32xf32>
    %19 = arith.mulf %16, %18 : vector<16x32xf32>
    %20 = arith.truncf %19 : vector<16x32xf32> to vector<16x32xbf16>
    %c0_1 = arith.constant 0 : index
    %c0_2 = arith.constant 0 : index
    %21 = vector.load %arg2[%c0_1, %c0_2] : memref<32x128xbf16, #tpu.memory_space<vmem>>, vector<32x128xbf16>
    %cst_3 = arith.constant dense<0.000000e+00> : vector<16x128xf32>
    %22 = tpu.matmul %20, %21, %cst_3 {dimension_numbers = #tpu.dot_dimension_numbers<[1], [0], [0], [1], [0, 0, 1, 1], [], []>} : vector<16x32xbf16>, vector<32x128xbf16>, vector<16x128xf32> -> vector<16x128xf32>
    %c0_4 = arith.constant 0 : index
    %c0_5 = arith.constant 0 : index
    %23 = vector.load %arg3[%c0_4, %c0_5] : memref<1x128xf32, #tpu.memory_space<vmem>>, vector<1x128xf32>
    %24 = vector.broadcast %23 : vector<1x128xf32> to vector<16x128xf32>
    %25 = arith.addf %22, %24 : vector<16x128xf32>
    %26 = tpu.iota {dimensions = array<i32: 1>} : vector<16x128xi32>
    %c16_i32 = arith.constant 16 : i32
    %27 = vector.broadcast %c16_i32 : i32 to vector<16x128xi32>
    %28 = arith.cmpi slt, %26, %27 : vector<16x128xi32>
    %cst_6 = arith.constant -1.000000e+30 : f32
    %29 = vector.broadcast %cst_6 : f32 to vector<16x128xf32>
    %30 = arith.select %28, %25, %29 : vector<16x128xi1>, vector<16x128xf32>
    %cst_7 = arith.constant dense<0xFF800000> : vector<16xf32>
    %31 = vector.multi_reduction <maximumf>, %30, %cst_7 [1] : vector<16x128xf32> to vector<16xf32>
    %32 = vector.shape_cast %31 : vector<16xf32> to vector<16x1xf32>
    %33 = vector.broadcast %32 : vector<16x1xf32> to vector<16x128xf32>
    %34 = arith.subf %30, %33 : vector<16x128xf32>
    %35 = math.exp %34 : vector<16x128xf32>
    %cst_8 = arith.constant dense<0.000000e+00> : vector<16xf32>
    %36 = vector.multi_reduction <add>, %35, %cst_8 [1] : vector<16x128xf32> to vector<16xf32>
    %37 = vector.shape_cast %36 : vector<16xf32> to vector<16x1xf32>
    %38 = tpu.reciprocal %37 {approx = true} : vector<16x1xf32> -> vector<16x1xf32>
    %39 = vector.broadcast %38 : vector<16x1xf32> to vector<16x128xf32>
    %40 = arith.mulf %35, %39 : vector<16x128xf32>
    %c0_9 = arith.constant 0 : index
    %c0_10 = arith.constant 0 : index
    %41 = vector.load %arg10[%c0_9, %c0_10] : memref<16x128xf32, #tpu.memory_space<vmem>>, vector<16x128xf32>
    tpu.vector_store %arg10[%c0_9, %c0_10], %40 {strides = array<i32>} : memref<16x128xf32, #tpu.memory_space<vmem>>, vector<16x128xf32>,
    %c0_11 = arith.constant 0 : index
    %c0_12 = arith.constant 0 : index
    %42 = vector.load %arg5[%c0_11, %c0_12] : memref<32x32xbf16, #tpu.memory_space<vmem>>, vector<32x32xbf16>
    %cst_13 = arith.constant dense<0.000000e+00> : vector<16x32xf32>
    %43 = tpu.matmul %20, %42, %cst_13 {dimension_numbers = #tpu.dot_dimension_numbers<[1], [0], [0], [1], [0, 0, 1, 1], [], []>} : vector<16x32xbf16>, vector<32x32xbf16>, vector<16x32xf32> -> vector<16x32xf32>
    %44 = arith.truncf %40 : vector<16x128xf32> to vector<16x128xbf16>
    %c0_14 = arith.constant 0 : index
    %c0_15 = arith.constant 0 : index
    %45 = vector.load %arg4[%c0_14, %c0_15] : memref<128x32xbf16, #tpu.memory_space<vmem>>, vector<128x32xbf16>
    %cst_16 = arith.constant dense<0.000000e+00> : vector<16x32xf32>
    %46 = tpu.matmul %44, %45, %cst_16 {dimension_numbers = #tpu.dot_dimension_numbers<[1], [0], [0], [1], [0, 0, 1, 1], [], []>} : vector<16x128xbf16>, vector<128x32xbf16>, vector<16x32xf32> -> vector<16x32xf32>
    %47 = arith.addf %43, %46 : vector<16x32xf32>
    %c0_17 = arith.constant 0 : index
    %c0_18 = arith.constant 0 : index
    %48 = vector.load %arg6[%c0_17, %c0_18] : memref<1x32xf32, #tpu.memory_space<vmem>>, vector<1x32xf32>
    %49 = vector.broadcast %48 : vector<1x32xf32> to vector<16x32xf32>
    %50 = arith.addf %47, %49 : vector<16x32xf32>
    %51 = math.tanh %50 : vector<16x32xf32>
    %52 = arith.truncf %51 : vector<16x32xf32> to vector<16x32xbf16>
    %c0_19 = arith.constant 0 : index
    %c0_20 = arith.constant 0 : index
    %53 = vector.load %arg7[%c0_19, %c0_20] : memref<32x128xbf16, #tpu.memory_space<vmem>>, vector<32x128xbf16>
    %cst_21 = arith.constant dense<0.000000e+00> : vector<16x128xf32>
    %54 = tpu.matmul %52, %53, %cst_21 {dimension_numbers = #tpu.dot_dimension_numbers<[1], [0], [0], [1], [0, 0, 1, 1], [], []>} : vector<16x32xbf16>, vector<32x128xbf16>, vector<16x128xf32> -> vector<16x128xf32>
    %c0_22 = arith.constant 0 : index
    %c0_23 = arith.constant 0 : index
    %55 = vector.load %arg8[%c0_22, %c0_23] : memref<1x128xf32, #tpu.memory_space<vmem>>, vector<1x128xf32>
    %56 = vector.broadcast %55 : vector<1x128xf32> to vector<16x128xf32>
    %57 = arith.addf %54, %56 : vector<16x128xf32>
    %cst_24 = arith.constant dense<0xFF800000> : vector<16xf32>
    %58 = vector.multi_reduction <maximumf>, %57, %cst_24 [1] : vector<16x128xf32> to vector<16xf32>
    %59 = vector.shape_cast %58 : vector<16xf32> to vector<16x1xf32>
    %60 = vector.broadcast %59 : vector<16x1xf32> to vector<16x128xf32>
    %61 = arith.subf %57, %60 : vector<16x128xf32>
    %62 = math.exp %61 : vector<16x128xf32>
    %cst_25 = arith.constant dense<0.000000e+00> : vector<16xf32>
    %63 = vector.multi_reduction <add>, %62, %cst_25 [1] : vector<16x128xf32> to vector<16xf32>
    %64 = vector.shape_cast %63 : vector<16xf32> to vector<16x1xf32>
    %65 = math.log %64 : vector<16x1xf32>
    %66 = arith.addf %65, %59 : vector<16x1xf32>
    %67 = vector.broadcast %66 : vector<16x1xf32> to vector<16x128xf32>
    %68 = arith.subf %57, %67 : vector<16x128xf32>
    %c0_26 = arith.constant 0 : index
    %c0_27 = arith.constant 0 : index
    %69 = vector.load %arg9[%c0_26, %c0_27] : memref<16x128xf32, #tpu.memory_space<vmem>>, vector<16x128xf32>
    tpu.vector_store %arg9[%c0_26, %c0_27], %68 {strides = array<i32>} : memref<16x128xf32, #tpu.memory_space<vmem>>, vector<16x128xf32>,
    return
  }
  func.func @transform_0(%arg0: i32) -> (i32, i32) {
    %c0_i32 = arith.constant 0 : i32
    %c0_i32_0 = arith.constant 0 : i32
    return %arg0, %c0_i32 : i32, i32
  }
  func.func @transform_1(%arg0: i32) -> (i32, i32) {
    %c0_i32 = arith.constant 0 : i32
    %c0_i32_0 = arith.constant 0 : i32
    %c0_i32_1 = arith.constant 0 : i32
    return %c0_i32, %c0_i32_0 : i32, i32
  }
  func.func @transform_2(%arg0: i32) -> (i32, i32) {
    %c0_i32 = arith.constant 0 : i32
    %c0_i32_0 = arith.constant 0 : i32
    %c0_i32_1 = arith.constant 0 : i32
    return %c0_i32, %c0_i32_0 : i32, i32
  }
  func.func @transform_3(%arg0: i32) -> (i32, i32) {
    %c0_i32 = arith.constant 0 : i32
    %c0_i32_0 = arith.constant 0 : i32
    %c0_i32_1 = arith.constant 0 : i32
    return %c0_i32, %c0_i32_0 : i32, i32
  }
  func.func @transform_4(%arg0: i32) -> (i32, i32) {
    %c0_i32 = arith.constant 0 : i32
    %c0_i32_0 = arith.constant 0 : i32
    %c0_i32_1 = arith.constant 0 : i32
    return %c0_i32, %c0_i32_0 : i32, i32
  }
  func.func @transform_5(%arg0: i32) -> (i32, i32) {
    %c0_i32 = arith.constant 0 : i32
    %c0_i32_0 = arith.constant 0 : i32
    %c0_i32_1 = arith.constant 0 : i32
    return %c0_i32, %c0_i32_0 : i32, i32
  }
  func.func @transform_6(%arg0: i32) -> (i32, i32) {
    %c0_i32 = arith.constant 0 : i32
    %c0_i32_0 = arith.constant 0 : i32
    %c0_i32_1 = arith.constant 0 : i32
    return %c0_i32, %c0_i32_0 : i32, i32
  }
  func.func @transform_7(%arg0: i32) -> (i32, i32) {
    %c0_i32 = arith.constant 0 : i32
    %c0_i32_0 = arith.constant 0 : i32
    %c0_i32_1 = arith.constant 0 : i32
    return %c0_i32, %c0_i32_0 : i32, i32
  }
  func.func @transform_8(%arg0: i32) -> (i32, i32) {
    %c0_i32 = arith.constant 0 : i32
    %c0_i32_0 = arith.constant 0 : i32
    return %arg0, %c0_i32 : i32, i32
  }
  func.func @transform_9(%arg0: i32) -> (i32, i32) {
    %c0_i32 = arith.constant 0 : i32
    %c0_i32_0 = arith.constant 0 : i32
    return %arg0, %c0_i32 : i32, i32
  }
}

</mosaic_0001>

<bundles_post_ra>
// kernel: tpu_custom_call.1
= control target key start
LH: loop header
LB: loop body
LE: loop exit
PB: predicated region body
PF: predicated region fallthrough
CT: control target
= control target key end

     0   :  { %15 = vsyncpa [#allocation3], 0  ;;  %s694_s0 = inlined_call_operand.vmem [shape: f32[16,128], index: 0, kind: input, shape index: {}]   ;;  %s695_s1 = inlined_call_operand.vmem [shape: bf16[32,128], index: 1, kind: input, shape index: {}]   ;;  %s696_s2 = inlined_call_operand.vmem [shape: f32[1,128], index: 2, kind: input, shape index: {}]   ;;  %s697_s3 = inlined_call_operand.vmem [shape: bf16[128,32], index: 3, kind: input, shape index: {}]   ;;  %s698_s4 = inlined_call_operand.vmem [shape: bf16[32,32], index: 4, kind: input, shape index: {}]   ;;  %s699_s5 = inlined_call_operand.vmem [shape: f32[1,32], index: 5, kind: input, shape index: {}]   ;;  %s700_s6 = inlined_call_operand.vmem [shape: bf16[32,128], index: 6, kind: input, shape index: {}]   ;;  %s701_s7 = inlined_call_operand.vmem [shape: f32[1,128], index: 7, kind: input, shape index: {}]   ;;  %s702_s8 = inlined_call_operand.hbm [shape: f32[16,128], index: 8, kind: output, shape index: {0}]   ;;  %s703_s9 = inlined_call_operand.hbm [shape: f32[16,128], index: 9, kind: output, shape index: {1}]  }
   0x1   :  { %v34_v0 = vld [vmem:[%s694_s0] sm:$0xff]  ;;  %v35_v1 = vld [vmem:[%s694_s0 + $0x8] sm:$0xff] }
   0x2   :  { %v385_v2 = vmul.f32 -1.442695, %v34_v0  ;;  %v386_v3 = vmul.f32 -1.442695, %v35_v1 }
   0x3   :  { %16 = vsyncpa [#allocation5], 0  ;;  %v36_v8 = vlaneseq  ;;  %s558_s0 = smov 64   ;;  %s559_s13 = smov 96   ;;  %v447_v41 = vld [vmem:[%s695_s1 + $0x8] sm:$0xff]  ;;  %v446_v43 = vld [vmem:[%s695_s1] sm:$0xff] }
   0x4   :  { %470 = vpow2.f32 %v385_v2  ;;  %v449_v42 = vld [vmem:[%s698_s4 + $0x8] sm:$0xff]  ;;  %139 = vmatpush.bf16.msra.mxu0 %v447_v41  ;;  %v448_v44 = vld [vmem:[%s698_s4] sm:$0xff]  ;;  %s560_s22 = smov 32   ;;  %vm129_vm11 = vcmask 261120   ;;  %v457_v58 = vld [vmem:[%s697_s3 + $0x38] sm:$0xff]  ;;  %s368_s23 = sshll.u32 %s703_s9, 4  ;;  %s369_s23 = int_to_ptr.hbm [resolvable:$true] %s368_s23 }
   0x5   :  { %472 = vpow2.f32 %v386_v3  ;;  %v621_v10 = vand.u32 127, %v36_v8  ;;  %271 = vmatpush.bf16.msra.mxu2 %v449_v42  ;;  %v467_v51 = vld [vmem:[%s696_s2] ss:$0 sm:$0xff]  ;;  %239 = vmatpush.bf16.msra.mxu1 %v457_v58  ;;  %v456_v59 = vld [vmem:[%s697_s3 + $0x30] sm:$0xff]  ;;  %v455_v60 = vld [vmem:[%s697_s3 + $0x28] sm:$0xff]  ;;  %s562_s4 = smov 128  }
   0x6   :  { %v451_v8 = vld [vmem:[%s697_s3 + $0x8] sm:$0xff]  ;;  %v468_v22 = vld [vmem:[%s699_s5] ss:$0 sm:$0xff]  ;;  %s561_s5 = smov [#allocation4]   ;;  %s563_s24 = smov 8  }
   0x7   :  { %vm38_vm2 = vcmp.ge.s32.totalorder %v621_v10, 64  ;;  %vm39_vm3 = vcmp.lt.s32.totalorder %v621_v10, 96  ;;  %vm147_vm12 = vcmp.lt.s32.totalorder %v621_v10, 16  ;;  %s564_s25 = smov [#allocation2]   ;;  %s355_s27 = sshll.u32 %s702_s8, 4  ;;  %s356_s27 = int_to_ptr.hbm [resolvable:$true] %s355_s27 }
   0x8   :  { %vm625_vm7 = vmand %vm38_vm2, %vm39_vm3  ;;  %140 = vmatpush.bf16.msra.mxu0 %v446_v43  ;;  %s353_s26 = sshll.u32 %s564_s25, 4  ;;  %s354_s26 = int_to_ptr.vmem [resolvable:$true] %s353_s26 }
   0x9   :  { %272 = vmatpush.bf16.msra.mxu2 %v448_v44  ;;  %240 = vmatpush.bf16.msra.mxu1 %v456_v59 }
   0xa   :  { %v471_v4 = vpop.eup %470 }
   0xb   :  { %v473_v5 = vpop.eup %472  ;;  %v49_v6 = vadd.f32 1.0, %v471_v4 }
   0xc   :  { %v50_v7 = vadd.f32 1.0, %v473_v5  ;;  %v454_v5 = vld [vmem:[%s697_s3 + $0x20] sm:$0xff] }
   0xd   :  { %474 = vrcp.f32 %v49_v6  ;;  %v62_v13 = vand.u32 2147483648, %v49_v6  ;;  %vm56_vm0 = vweird.f32 %v49_v6  ;;  %v60_v16 = vand.u32 2147483647, %v49_v6  ;;  %241 = vmatpush.bf16.msra.mxu1 %v455_v60 }
   0xe   :  { %476 = vrcp.f32 %v50_v7  ;;  %vm71_vm4 = vweird.f32 %v50_v7  ;;  %v77_v21 = vand.u32 2147483648, %v50_v7  ;;  %v75_v24 = vand.u32 2147483647, %v50_v7 }
   0xf   :  { %478 = vtanh.f32 %v34_v0  ;;  %v63_v19 = vor.u32 1.1754944e-38, %v62_v13  ;;  %vm61_vm8 = vcmp.eq.f32.partialorder %v60_v16, 8.507059e+37 }
  0x10   :  { %480 = vtanh.f32 %v35_v1  ;;  %v78_v29 = vor.u32 1.1754944e-38, %v77_v21  ;;  %vm76_vm10 = vcmp.eq.f32.partialorder %v75_v24, 8.507059e+37 }
  0x11   :  { %242 = vmatpush.bf16.msra.mxu1 %v454_v5 }
  0x13   :  { %v475_v9 = vpop.eup %474 }
  0x14   :  { %v477_v11 = vpop.eup %476  ;;  %v52_v12 = vmul.f32 %v475_v9, %v49_v6  ;;  %vm57_vm1 = vweird.f32 %v475_v9  ;;  %v453_v6 = vld [vmem:[%s697_s3 + $0x18] sm:$0xff] }
  0x15   :  { %v67_v14 = vmul.f32 %v477_v11, %v50_v7  ;;  %vm72_vm5 = vweird.f32 %v477_v11  ;;  %vm58_vm6 = vmor %vm56_vm0, %vm57_vm1  ;;  %v479_v25 = vpop.eup %478  ;;  %243 = vmatpush.bf16.msra.mxu1 %v453_v6  ;;  %v452_v7 = vld [vmem:[%s697_s3 + $0x10] sm:$0xff] }
  0x16   :  { %v53_v15 = vsub.f32 1.0, %v52_v12  ;;  %vm73_vm9 = vmor %vm71_vm4, %vm72_vm5  ;;  %v481_v32 = vpop.eup %480 }
  0x17   :  { %v68_v17 = vsub.f32 1.0, %v67_v14 }
  0x18   :  { %v54_v18 = vmul.f32 %v475_v9, %v53_v15 }
  0x19   :  { %v69_v20 = vmul.f32 %v477_v11, %v68_v17  ;;  %244 = vmatpush.bf16.msra.mxu1 %v452_v7  ;;  %v459_v17 = vld [vmem:[%s700_s6 + $0x8] sm:$0xff] }
  0x1a   :  { %v55_v23 = vadd.f32 %v475_v9, %v54_v18  ;;  %317 = vmatpush.bf16.msra.mxu3 %v459_v17  ;;  %v458_v18 = vld [vmem:[%s700_s6] sm:$0xff] }
  0x1b   :  { %v70_v26 = vadd.f32 %v477_v11, %v69_v20 }
  0x1c   :  { %v59_v27 = vsel %vm58_vm6, %v475_v9, %v55_v23  ;;  %v450_v9 = vld [vmem:[%s697_s3] sm:$0xff] }
  0x1d   :  { %v64_v28 = vsel %vm61_vm8, %v63_v19, %v59_v27  ;;  %v74_v31 = vsel %vm73_vm9, %v477_v11, %v70_v26  ;;  %245 = vmatpush.bf16.msra.mxu1 %v451_v8 }
  0x1e   :  { %v81_v30 = vsel %vm625_vm7, %v479_v25, %v64_v28  ;;  %v79_v33 = vsel %vm76_vm10, %v78_v29, %v74_v31  ;;  %318 = vmatpush.bf16.msra.mxu3 %v458_v18  ;;  %v469_v31 = vld [vmem:[%s701_s7] ss:$0 sm:$0xff]  ;;  %s366_s7 = sshll.u32 %s561_s5, 4  ;;  %s367_s7 = int_to_ptr.vmem [resolvable:$true] %s366_s7 }
  0x1f   :  { %85 = vrot.lane.b32.xlu0 %v81_v30, %s558_s0  ;;  %v82_v34 = vsel %vm625_vm7, %v481_v32, %v79_v33 }
  0x21   :  { %246 = vmatpush.bf16.msra.mxu1 %v450_v9 }
  0x27   :  { %87 = vrot.lane.b32.xlu0 %v82_v34, %s558_s0 }
  0x91   :  { %v86_v35 = vpop.permute.xlu0 %85 }
  0x92   :  { %v91_v36 = vmul.f32 %v86_v35, %v81_v30 }
  0x94   :  { %482 = vtanh.f32 %v91_v36 }
  0x99   :  { %v88_v37 = vpop.permute.xlu0 %87 }
  0x9a   :  { %v483_v38 = vpop.eup %482  ;;  %v92_v39 = vmul.f32 %v88_v37, %v82_v34 }
  0x9b   :  { %97 = vrot.lane.b32.xlu1 %v483_v38, %s559_s13 }
  0x9c   :  { %484 = vtanh.f32 %v92_v39 }
  0xa2   :  { %v485_v40 = vpop.eup %484 }
  0xa3   :  { %99 = vrot.lane.b32.xlu1 %v485_v40, %s559_s13 }
 0x10d   :  { %v98_v45 = vpop.permute.xlu1 %97 }
 0x10e   :  { %v103_v47 = vmul.f32 %v98_v45, %v81_v30 }
 0x115   :  { %v100_v46 = vpop.permute.xlu1 %99 }
 0x116   :  { %v104_v48 = vmul.f32 %v100_v46, %v82_v34 }
 0x118   :  { %v105_v49 = vpack.c.bf16 %v104_v48, %v103_v47 }
 0x11a   :  { %115 = vrot.lane.b32.xlu2 %v105_v49, %s560_s22 }
 0x174   :  { %v116_v50 = vpop.permute.xlu2 %115 }
 0x175   :  { %395 = vmatmul.msk.bf16.vlgmr.msra.gmra.mxu0 %vm129_vm11, %v116_v50  ;;  %436 = vmatmul.msk.bf16.vlgmr.msra.gmra.mxu2 %vm129_vm11, %v116_v50 }
 0x1f2   :  { %v142_v52 = vpop.f32.mrf.mxu0 }
 0x1f3   :  { %v143_v53 = vadd.f32 %v467_v51, %v142_v52 }
 0x1f5   :  { %v148_v54 = vsel %vm147_vm12, %v143_v53, -1e+30 }
 0x1f6   :  { %150 = vmax.xlane.f32.xlu2 %v148_v54 }
 0x1f8   :  { %v274_v19 = vpop.f32.mrf.mxu2 }
 0x1fa   :  { %v144_v55 = vpop.f32.mrf.mxu0 }
 0x1fb   :  { %v145_v56 = vadd.f32 %v467_v51, %v144_v55 }
 0x1fd   :  { %v149_v57 = vsel %vm147_vm12, %v145_v56, -1e+30 }
 0x1fe   :  { %152 = vmax.xlane.f32.xlu0 %v149_v57 }
 0x200   :  { %v276_v23 = vpop.f32.mrf.mxu2 }
 0x269   :  { %v151_v61 = vpop.xlane.xlu2 %150 }
 0x26a   :  { %v154_v62 = vsub.f32 %v148_v54, %v151_v61 }
 0x26c   :  { %v156_v63 = vmul.f32 1.442695, %v154_v62 }
 0x26e   :  { %486 = vpow2.f32 %v156_v63 }
 0x271   :  { %v153_v0 = vpop.xlane.xlu0 %152 }
 0x272   :  { %v155_v1 = vsub.f32 %v149_v57, %v153_v0 }
 0x274   :  { %v487_v2 = vpop.eup %486  ;;  %v158_v3 = vmul.f32 1.442695, %v155_v1 }
 0x275   :  { %160 = vadd.xlane.f32.xlu1 %v487_v2 }
 0x276   :  { %488 = vpow2.f32 %v158_v3 }
 0x27c   :  { %v489_v4 = vpop.eup %488 }
 0x27d   :  { %162 = vadd.xlane.f32.xlu2 %v489_v4 }
 0x2e8   :  { %v161_v10 = vpop.xlane.xlu1 %160 }
 0x2e9   :  { %490 = vrcp.f32 %v161_v10 }
 0x2ef   :  { %v491_v11 = vpop.eup %490 }
 0x2f0   :  { %v163_v12 = vpop.xlane.xlu2 %162  ;;  %v166_v13 = vmul.f32 %v491_v11, %v487_v2 }
 0x2f1   :  { %492 = vrcp.f32 %v163_v12 }
 0x2f2   :  { %168 = vst [vmem:[#allocation4] sm:$0xff] %v166_v13 }
 0x2f7   :  { %v493_v14 = vpop.eup %492 }
 0x2f8   :  { %v167_v15 = vmul.f32 %v493_v14, %v489_v4 }
 0x2fa   :  { %169 = vst [vmem:[#allocation4 + $0x8] sm:$0xff] %v167_v15  ;;  %v174_v16 = vpack.c.bf16 %v167_v15, %v166_v13 }
 0x2fb   :  { %374 = dma.vmem_to_hbm [thread:$0]  %s367_s7, 256, %s369_s23, [#allocation5], %s562_s4, %s562_s4, %s563_s24  }
 0x2fc   :  { %247 = vmatmul.bf16.vlgmr.msra.gmra.mxu1 %v174_v16 }
 0x379   :  { %v248_v20 = vpop.f32.mrf.mxu1 }
 0x37a   :  { %v275_v21 = vadd.f32 %v274_v19, %v248_v20 }
 0x37c   :  { %v283_v24 = vadd.f32 %v468_v22, %v275_v21 }
 0x37e   :  { %494 = vtanh.f32 %v283_v24 }
 0x381   :  { %v250_v25 = vpop.f32.mrf.mxu1 }
 0x382   :  { %v277_v26 = vadd.f32 %v276_v23, %v250_v25 }
 0x384   :  { %v284_v27 = vadd.f32 %v468_v22, %v277_v26  ;;  %v495_v28 = vpop.eup %494 }
 0x386   :  { %496 = vtanh.f32 %v284_v27 }
 0x38c   :  { %v497_v29 = vpop.eup %496 }
 0x38d   :  { %v287_v30 = vpack.c.bf16 %v497_v29, %v495_v28 }
 0x38f   :  { %445 = vmatmul.msk.bf16.vlgmr.msra.gmra.mxu3 %vm129_vm11, %v287_v30 }
 0x412   :  { %v320_v32 = vpop.f32.mrf.mxu3 }
 0x413   :  { %v321_v33 = vadd.f32 %v469_v31, %v320_v32 }
 0x415   :  { %325 = vmax.xlane.f32.xlu2 %v321_v33 }
 0x41a   :  { %v322_v34 = vpop.f32.mrf.mxu3 }
 0x41b   :  { %v323_v35 = vadd.f32 %v469_v31, %v322_v34 }
 0x41d   :  { %327 = vmax.xlane.f32.xlu0 %v323_v35 }
 0x488   :  { %v326_v36 = vpop.xlane.xlu2 %325 }
 0x489   :  { %v329_v37 = vsub.f32 %v321_v33, %v326_v36 }
 0x48b   :  { %v331_v38 = vmul.f32 1.442695, %v329_v37 }
 0x48d   :  { %498 = vpow2.f32 %v331_v38 }
 0x490   :  { %v328_v39 = vpop.xlane.xlu0 %327 }
 0x491   :  { %v330_v40 = vsub.f32 %v323_v35, %v328_v39 }
 0x493   :  { %v499_v41 = vpop.eup %498  ;;  %v333_v42 = vmul.f32 1.442695, %v330_v40 }
 0x494   :  { %335 = vadd.xlane.f32.xlu1 %v499_v41 }
 0x495   :  { %500 = vpow2.f32 %v333_v42 }
 0x49b   :  { %v501_v43 = vpop.eup %500 }
 0x49c   :  { %337 = vadd.xlane.f32.xlu2 %v501_v43 }
 0x507   :  { %v336_v44 = vpop.xlane.xlu1 %335 }
 0x508   :  { %502 = vlog2.f32 %v336_v44 }
 0x50e   :  { %v503_v45 = vpop.eup %502 }
 0x50f   :  { %v340_v46 = vmul.f32 0.6931472, %v503_v45  ;;  %v338_v47 = vpop.xlane.xlu2 %337 }
 0x510   :  { %504 = vlog2.f32 %v338_v47 }
 0x511   :  { %v343_v48 = vadd.f32 %v340_v46, %v326_v36 }
 0x513   :  { %v345_v49 = vsub.f32 %v321_v33, %v343_v48 }
 0x515   :  { %347 = vst [vmem:[#allocation2] sm:$0xff] %v345_v49 }
 0x516   :  { %v505_v50 = vpop.eup %504 }
 0x517   :  { %v342_v51 = vmul.f32 0.6931472, %v505_v50 }
 0x519   :  { %v344_v52 = vadd.f32 %v342_v51, %v328_v39 }
 0x51b   :  { %v346_v53 = vsub.f32 %v323_v35, %v344_v52 }
 0x51d   :  { %348 = vst [vmem:[#allocation2 + $0x8] sm:$0xff] %v346_v53 }
 0x51e   :  { %361 = dma.vmem_to_hbm [thread:$0]  %s354_s26, 256, %s356_s27, [#allocation3], %s562_s4, %s562_s4, %s563_s24  }
 0x51f   :  { %554 = dma.done.wait [#allocation3], 256  }
 0x520   :  { %555 = vsyncadd [#allocation3], 4294967040 }
 0x521   :  { %556 = dma.done.wait [#allocation5], 256  }
 0x522   :  { %557 = vsyncadd [#allocation5], 4294967040 }
 0x523   :  { %383 = vsyncpa [#allocation3], 1 }
 0x524   :  { %384 = vsyncpa [#allocation5], 1 }

</bundles_post_ra>
